<compile_context>
chip_gen: v6e
topology: v6e:2x2x1
jax: 0.10.0
libtpu: 0.0.40
codegen_flags: <defaults>
</compile_context>

<pallas_src>
import functools

import jax
import jax.numpy as jnp
import numpy as np
from jax import lax
from jax.experimental import pallas as pl
from jax.experimental.pallas import tpu as pltpu


def _masked_conv1d_kernel(x_ref, w_ref, b_ref, o_ref, carry_ref, *,
                          cutoff, pad_left, multi_tile, compute_dtype):
    """One (batch element, L tile) per grid step.

    x_ref:     (1, C_in, TL)            input tile, NCL layout (L on lanes)
    w_ref:     (C_out, cutoff*C_in)     fused live-tap weights
    b_ref:     (C_out, 1)               bias (f32)
    o_ref:     (1, C_out, TL)           output tile (lane-dense along L)
    carry_ref: (C_in, max(pad_left,1))  left halo carried across L tiles
    """
    l = pl.program_id(1)
    tl = o_ref.shape[2]

    x = x_ref[0].astype(jnp.float32)                       # (C_in, TL)

    if pad_left > 0:
        if multi_tile:
            @pl.when(l == 0)
            def _init_carry():
                # Left zero padding of the conv == zero-initialised carry.
                carry_ref[...] = jnp.zeros_like(carry_ref)
            left = carry_ref[...]
        else:
            left = jnp.zeros((x.shape[0], pad_left), jnp.float32)
        ext = jnp.concatenate([left, x], axis=1)           # (C_in, pad_left+TL)
    else:
        ext = x

    # im2col: stack the `cutoff` shifted views along the channel axis so the
    # whole conv becomes a single MXU matmul (contraction dim = cutoff*C_in).
    cols = [ext[:, k:k + tl] for k in range(cutoff)]
    x2 = cols[0] if cutoff == 1 else jnp.concatenate(cols, axis=0)
    x2 = x2.astype(compute_dtype)

    acc = jnp.dot(w_ref[...], x2, preferred_element_type=jnp.float32)
    o_ref[0] = (acc + b_ref[...]).astype(o_ref.dtype)

    if pad_left > 0 and multi_tile:
        # Tail of this tile is the left halo of the next tile (same batch n).
        carry_ref[...] = x[:, tl - pad_left:]


def masked_conv1d(x_ncl, weight, bias, mask_type, *,
                  compute_dtype=None, tile_l=1024):
    """Forward pass of MaskedConv1d.

    x_ncl:  (N, C_in, L)      activations, NCL like torch.nn.Conv1d
    weight: (C_out, C_in, K)  un-masked weights (mask applied here)
    bias:   (C_out,)
    Returns (N, C_out, L)     (padding = K//2, stride = 1)
    """
    assert mask_type in ("A", "B")
    N, C_in, L = x_ncl.shape
    C_out, C_in_w, K = weight.shape
    assert C_in_w == C_in
    assert K % 2 == 1, "odd kernel size assumed (PixelCNN 'same' conv)"
    # TODO(synk): even kernel sizes change torch's output length (L+1) and are
    # not supported; neither are stride/dilation/groups != 1.

    out_dtype = x_ncl.dtype
    pad_left = K // 2
    cutoff = K // 2 + (1 if mask_type == "B" else 0)   # first zeroed tap

    if cutoff == 0:  # mask 'A' with K == 1: the whole kernel is masked away.
        return jnp.broadcast_to(
            bias.astype(out_dtype)[None, :, None], (N, C_out, L))

    cdt = np.dtype(compute_dtype) if compute_dtype is not None \
        else np.dtype(x_ncl.dtype)

    # --- parameters: keep only the live taps, fuse (tap, cin) into one dim.
    w_live = weight[:, :, :cutoff]                                  # (Co,Ci,cut)
    w2 = jnp.transpose(w_live, (0, 2, 1)).reshape(
        C_out, cutoff * C_in).astype(cdt)                           # (Co, cut*Ci)
    b2 = bias.astype(jnp.float32).reshape(C_out, 1)

    # --- choose the L tile (lanes): full length if it fits, else 128-multiple.
    if L <= tile_l:
        TL, num_tiles, L_p = L, 1, L
    else:
        assert tile_l % 128 == 0
        TL = tile_l
        num_tiles = (L + TL - 1) // TL
        L_p = num_tiles * TL
        assert pad_left <= TL

    x_in = x_ncl.astype(cdt)
    if L_p != L:
        x_in = jnp.pad(x_in, ((0, 0), (0, 0), (0, L_p - L)))

    # --- explicit VMEM budget: double-buffered blocks + scratch, with margin.
    itemsize = int(np.dtype(cdt).itemsize)
    est = (2 * C_in * TL * itemsize                 # x tile (double buffered)
           + 2 * C_out * cutoff * C_in * itemsize   # fused weights
           + 2 * C_out * 4                          # bias
           + 2 * C_out * TL * 4                     # output tile
           + C_in * max(pad_left, 1) * 4)           # halo carry scratch
    vmem_limit = int(min(max(4 * est, 16 * 1024 * 1024), 64 * 1024 * 1024))

    kernel = functools.partial(
        _masked_conv1d_kernel, cutoff=cutoff, pad_left=pad_left,
        multi_tile=(num_tiles > 1), compute_dtype=cdt)

    out = pl.pallas_call(
        kernel,
        out_shape=jax.ShapeDtypeStruct((N, C_out, L_p), out_dtype),
        grid_spec=pltpu.PrefetchScalarGridSpec(
            num_scalar_prefetch=0,
            grid=(N, num_tiles),
            in_specs=[
                pl.BlockSpec((1, C_in, TL), lambda n, l: (n, 0, l)),
                pl.BlockSpec((C_out, cutoff * C_in), lambda n, l: (0, 0)),
                pl.BlockSpec((C_out, 1), lambda n, l: (0, 0)),
            ],
            out_specs=pl.BlockSpec((1, C_out, TL), lambda n, l: (n, 0, l)),
            scratch_shapes=[pltpu.VMEM((C_in, max(pad_left, 1)), jnp.float32)],
        ),
        compiler_params=pltpu.CompilerParams(
            # Batch axis can shard across TensorCores; the L axis is kept
            # sequential because of the cross-tile halo carry.
            dimension_semantics=("parallel", "arbitrary"),
            vmem_limit_bytes=vmem_limit),
    )(x_in, w2, b2)

    if L_p != L:
        out = out[:, :, :L]
    return out


def _reference_conv1d(x_ncl, weight, bias, mask_type):
    """Pure-JAX reference matching torch.nn.Conv1d(padding=K//2) with mask."""
    K = weight.shape[2]
    cutoff = K // 2 + (1 if mask_type == "B" else 0)
    mask = (jnp.arange(K) < cutoff).astype(weight.dtype)
    w = weight * mask[None, None, :]
    out = lax.conv_general_dilated(
        x_ncl, w, window_strides=(1,), padding=[(K // 2, K // 2)],
        dimension_numbers=("NCH", "OIH", "NCH"))
    return out + bias[None, :, None]


if __name__ == "__main__":
    key = jax.random.PRNGKey(0)
    kx, kw, kb, kx2 = jax.random.split(key, 4)

    # Small PixelCNN-style shapes.
    N, C_in, C_out, L, K = 2, 4, 8, 16, 5
    x = jax.random.normal(kx, (N, C_in, L), dtype=jnp.float32)
    weight = 0.1 * jax.random.normal(kw, (C_out, C_in, K), dtype=jnp.float32)
    bias = 0.1 * jax.random.normal(kb, (C_out,), dtype=jnp.float32)

    # 1) mask 'A' and 'B', f32 path (single L tile).
    for mt in ("A", "B"):
        fwd = jax.jit(functools.partial(masked_conv1d, mask_type=mt))
        out = jax.block_until_ready(fwd(x, weight, bias))
        ref = _reference_conv1d(x, weight, bias, mt)
        np.testing.assert_allclose(np.asarray(out), np.asarray(ref),
                                   rtol=1e-5, atol=1e-5)

    # 2) multi-tile path (exercises the cross-tile halo carry).
    L2 = 384
    x_long = jax.random.normal(kx2, (N, C_in, L2), dtype=jnp.float32)
    fwd_t = jax.jit(functools.partial(masked_conv1d, mask_type="B",
                                      tile_l=128))
    out_t = jax.block_until_ready(fwd_t(x_long, weight, bias))
    ref_t = _reference_conv1d(x_long, weight, bias, "B")
    np.testing.assert_allclose(np.asarray(out_t), np.asarray(ref_t),
                               rtol=1e-5, atol=1e-5)

    # 3) bf16-compute / f32-accumulate option (v6e/v7x MXU fast path).
    fwd_bf16 = jax.jit(functools.partial(masked_conv1d, mask_type="A",
                                         compute_dtype=jnp.bfloat16))
    out_bf16 = jax.block_until_ready(fwd_bf16(x, weight, bias))
    ref_a = _reference_conv1d(x, weight, bias, "A")
    np.testing.assert_allclose(np.asarray(out_bf16), np.asarray(ref_a),
                               rtol=5e-2, atol=5e-2)

    print("KERNEL_OK")
</pallas_src>

<mosaic_0001>
module attributes {stable_mosaic.version = 11 : i64} {
  func.func @_masked_conv1d_kernel(%arg0: i32, %arg1: i32, %arg2: memref<1x4x16xf32, #tpu.memory_space<vmem>>, %arg3: memref<8x8xf32, #tpu.memory_space<vmem>>, %arg4: memref<8x1xf32, #tpu.memory_space<vmem>>, %arg5: memref<1x8x16xf32, #tpu.memory_space<vmem>>, %arg6: memref<4x2xf32, #tpu.memory_space<vmem>>) attributes {dimension_semantics = [#tpu.dimension_semantics<parallel>, #tpu.dimension_semantics<arbitrary>], iteration_bounds = array<i64: 2, 1>, scalar_prefetch = 0 : i64, scratch_operands = 1 : i64, tpu.core_type = #tpu.core_type<tc>, window_params = [{transform_indices = @transform_0, window_bounds = array<i64: 1, 4, 16>}, {pipeline_mode = #tpu.pipeline_mode<synchronous>, transform_indices = @transform_1, window_bounds = array<i64: 8, 8>}, {pipeline_mode = #tpu.pipeline_mode<synchronous>, transform_indices = @transform_2, window_bounds = array<i64: 8, 1>}, {transform_indices = @transform_3, window_bounds = array<i64: 1, 8, 16>}]} {
    %c0 = arith.constant 0 : index
    %c0_0 = arith.constant 0 : index
    %c0_1 = arith.constant 0 : index
    %0 = vector.load %arg2[%c0, %c0_0, %c0_1] : memref<1x4x16xf32, #tpu.memory_space<vmem>>, vector<1x4x16xf32>
    %1 = vector.shape_cast %0 : vector<1x4x16xf32> to vector<4x16xf32>
    %cst = arith.constant 0.000000e+00 : f32
    %2 = vector.broadcast %cst : f32 to vector<4x2xf32>
    %3 = tpu.concatenate %2, %1 in 1 : vector<4x2xf32>, vector<4x16xf32> -> vector<4x18xf32>
    %4 = vector.extract_strided_slice %3 {offsets = [0, 0], sizes = [4, 16], strides = [1, 1]} : vector<4x18xf32> to vector<4x16xf32>
    %5 = vector.extract_strided_slice %3 {offsets = [0, 1], sizes = [4, 16], strides = [1, 1]} : vector<4x18xf32> to vector<4x16xf32>
    %6 = tpu.concatenate %4, %5 in 0 : vector<4x16xf32>, vector<4x16xf32> -> vector<8x16xf32>
    %c0_2 = arith.constant 0 : index
    %c0_3 = arith.constant 0 : index
    %7 = vector.load %arg3[%c0_2, %c0_3] : memref<8x8xf32, #tpu.memory_space<vmem>>, vector<8x8xf32>
    %cst_4 = arith.constant dense<0.000000e+00> : vector<8x16xf32>
    %8 = tpu.matmul %7, %6, %cst_4 {dimension_numbers = #tpu.dot_dimension_numbers<[1], [0], [0], [1], [0, 0, 1, 1], [], []>} : vector<8x8xf32>, vector<8x16xf32>, vector<8x16xf32> -> vector<8x16xf32>
    %c0_5 = arith.constant 0 : index
    %c0_6 = arith.constant 0 : index
    %9 = vector.load %arg4[%c0_5, %c0_6] : memref<8x1xf32, #tpu.memory_space<vmem>>, vector<8x1xf32>
    %10 = vector.broadcast %9 : vector<8x1xf32> to vector<8x16xf32>
    %11 = arith.addf %8, %10 : vector<8x16xf32>
    %c0_7 = arith.constant 0 : index
    %c0_8 = arith.constant 0 : index
    %c0_9 = arith.constant 0 : index
    %12 = vector.load %arg5[%c0_7, %c0_8, %c0_9] : memref<1x8x16xf32, #tpu.memory_space<vmem>>, vector<1x8x16xf32>
    %13 = vector.shape_cast %12 : vector<1x8x16xf32> to vector<8x16xf32>
    %14 = vector.shape_cast %11 : vector<8x16xf32> to vector<1x8x16xf32>
    tpu.vector_store %arg5[%c0_7, %c0_8, %c0_9], %14 {strides = array<i32>} : memref<1x8x16xf32, #tpu.memory_space<vmem>>, vector<1x8x16xf32>,
    return
  }
  func.func @transform_0(%arg0: i32, %arg1: i32) -> (i32, i32, i32) {
    %c0_i32 = arith.constant 0 : i32
    %c0_i32_0 = arith.constant 0 : i32
    return %arg0, %c0_i32, %arg1 : i32, i32, i32
  }
  func.func @transform_1(%arg0: i32, %arg1: i32) -> (i32, i32) {
    %c0_i32 = arith.constant 0 : i32
    %c0_i32_0 = arith.constant 0 : i32
    %c0_i32_1 = arith.constant 0 : i32
    return %c0_i32, %c0_i32_0 : i32, i32
  }
  func.func @transform_2(%arg0: i32, %arg1: i32) -> (i32, i32) {
    %c0_i32 = arith.constant 0 : i32
    %c0_i32_0 = arith.constant 0 : i32
    %c0_i32_1 = arith.constant 0 : i32
    return %c0_i32, %c0_i32_0 : i32, i32
  }
  func.func @transform_3(%arg0: i32, %arg1: i32) -> (i32, i32, i32) {
    %c0_i32 = arith.constant 0 : i32
    %c0_i32_0 = arith.constant 0 : i32
    return %arg0, %c0_i32, %arg1 : i32, i32, i32
  }
}

</mosaic_0001>

<bundles_post_ra>
// kernel: masked_conv1d.1
= control target key start
LH: loop header
LB: loop body
LE: loop exit
PB: predicated region body
PF: predicated region fallthrough
CT: control target
= control target key end

     0   :  { %8 = vsyncpa [#allocation4], 0  ;;  %s670_s0 = inlined_call_operand.vmem [shape: f32[2,4,16], index: 0, kind: input, shape index: {}]   ;;  %s671_s1 = inlined_call_operand.vmem [shape: f32[8,8], index: 1, kind: input, shape index: {}]   ;;  %s672_s2 = inlined_call_operand.vmem [shape: f32[8,1], index: 2, kind: input, shape index: {}]   ;;  %s673_s3 = inlined_call_operand.hbm [shape: f32[2,8,16], index: 3, kind: output, shape index: {}]  }
   0x1   :  { %10 = vsyncpa [#allocation4 + $0x1], 0  ;;  %s559_s12 = smov 0   ;;  %s561_s13 = smov 0  }
   0x2   :  { %s563_s14 = smov 0   ;;  %s565_s15 = smov 0  }
   0x3   :  { %s567_s16 = smov 0   ;;  %s569_s17 = smov 0  }
   0x4 LB: > { %s374_s18 = sadd.s32 4294967295, %s531_s17   ;;  %s375_s19 = sadd.s32 4294967294, %s531_s17   ;;  %s531_s17 = sphi %s569_s17, %s16_s17   ;;  %s527_s16 = sphi %s567_s16, %s680_s16   ;;  %s523_s15 = sphi %s565_s15, %s679_s15   ;;  %s519_s14 = sphi %s563_s14, %s678_s14   ;;  %s515_s13 = sphi %s561_s13, %s677_s13   ;;  %s511_s12 = sphi %s559_s12, %s676_s12  }
   0x5   : > { %s28_s20 = sadd.s32 1, %s527_s16  ;;  %s107_s21 = sadd.s32 1, %s519_s14 }
   0x6   : > { %p30_p0 = scmp.ge.s32.totalorder %s28_s20, 2  ;;  %p117_p1 = scmp.ne.s32.totalorder %s519_s14, %s515_s13 }
   0x7   : > { %p118_p2 = scmp.eq.s32.totalorder %s374_s18, 1  ;;  %p123_p3 = scmp.ne.s32.totalorder %s515_s13, %s511_s12 }
   0x8   : > { %s682_s20 = smov (%p30_p0, %s28_s20), 0  ;;  %p124_p5 = scmp.eq.s32.totalorder %s375_s19, 1 }
   0x9   : > { %p599_p4 = por %p118_p2, %p117_p1  ;;  %s102_s23 = ssub.s32 %s527_s16, %s682_s20 }
   0xa   : > { %p378_p6 = scmp.ge.s32.totalorder %s531_s17, 1  ;;  %p105_p7 = scmp.eq.s32.totalorder %s102_s23, 0 }
   0xb   : > { %p606_p8 = por %p124_p5, %p123_p3  ;;  %p158_p9 = scmp.lt.s32.totalorder %s531_s17, 3 }
   0xc   : > { %s612_s25 = scalar_select %p105_p7, %s519_s14, %s107_s21  }
   0xd   : > { %p159_p10 = pnand %p378_p6, %p158_p9 }
   0xe   : > { %p184_p11 = scmp.lt.s32.totalorder (!%p159_p10), %s523_s15, 1  ;;  %s533_s4 = smov (!%p159_p10), 2  }
   0xf   : > { %162 = sbr.rel (%p159_p10) target bundleno = 468 (0x1d4), region = 32  ;;  %s537_s7 = smov (!%p159_p10), 127  }
  0x10   : > { %s181_s10 = sand.u32 (!%p159_p10), 1, %s515_s13   ;;  %s383_s18 = sshll.u32 (!%p159_p10), %s523_s15, 7 }
  0x11   : > { %s379_s11 = sshll.u32 (!%p159_p10), %s181_s10, 3  ;;  %s289_s28 = scalar_lea.sflag (!%p159_p10), [#allocation4], %s181_s10 }
  0x12   : > { %s183_s19 = scalar_lea.vmem (!%p159_p10), [#allocation3], %s379_s11 }
  0x13   : > { %s303_s21 = sshll.u32 (!%p159_p10), %s183_s19, 4  ;;  %s304_s21 = int_to_ptr.vmem [resolvable:$true] %s303_s21 }
  0x14   : > { %s185_s26 = scalar_select %p184_p11, %s523_s15, 1  ;;  %v534_v1 = vmov 0.0   ;;  %vm535_vm0 = vmmov 0   ;;  %v206_v2 = vld [vmem:[%s672_s2] sm:$0xff]  ;;  %v536_v3 = vmov 0   ;;  %vm196_vm1 = vcmask 15360  }
  0x15   : > { %388 = vmatprep.subr.mxu0 %v534_v1  ;;  %390 = vmatprep.mubr.msk.f32.mxu0 %vm535_vm0, %v534_v1  ;;  %vm203_vm2 = vcmask 1043456   ;;  %v205_v8 = vld [vmem:[%s671_s1] sm:$0xff]  ;;  %vm212_vm3 = vcmask 64512   ;;  %vm286_vm4 = vcmask 130048   ;;  %s455_s29 = scalar_lea.vmem %s304_s21, 128  ;;  %s538_s15 = smov [#allocation3]  }
  0x16   : > { %s380_s27 = sshll.u32 %s185_s26, 2  ;;  %453 = vset.pattern.permute.xlu1 %v536_v3  ;;  %454 = vset.pattern.permute.xlu0 %v536_v3  ;;  %p456_p12 = scmp.ne.s32.totalorder %s304_s21, %s455_s29 }
  0x17   : > { %s190_s30 = scalar_lea.vmem %s670_s0, %s380_s27  ;;  %209 = vperm.xlu1 %453, %v206_v2   ;;  %s630_s27 = scalar_lea.hbm %s673_s3, %s383_s18 }
  0x18   : > { %v191_v0 = vld [vmem:[%s190_s30] sm:$0xf]  ;;  %p457_p13 = pnand %p456_p12, %p599_p4  ;;  %s459_s30 = sshll.u32 %s538_s15, 4  ;;  %s460_s30 = int_to_ptr.vmem [resolvable:$false] %s459_s30 }
  0x19   : > { %193 = vrot.lane.b32.xlu0 %v191_v0, %s533_s4  ;;  %s461_s4 = scalar_lea.vmem %s460_s30, 256  ;;  %p462_p1 = scmp.lt.s32.totalorder %s304_s21, %s460_s30 }
  0x1a   : > { %p458_p0 = pneg %p457_p13  ;;  %p463_p2 = scmp.lt.s32.totalorder %s461_s4, %s455_s29 }
  0x1c   : > { %p464_p3 = por %p463_p2, %p462_p1 }
  0x1e   : > { %p465_p5 = pnand %p464_p3, %p458_p0 }
  0x8b   : > { %v194_v4 = vpop.permute.xlu0 %193 }
  0x8c   : > { %v197_v5 = vsel %vm196_vm1, 0.0, %v194_v4 }
  0x8d   : > { %v199_v6 = vrot.slane %v197_v5, 4 }
  0x8f   : > { %200 = vrot.lane.b32.xlu0 %v199_v6, %s537_s7 }
  0x92   : > { %v210_v10 = vpop.permute.xlu1 %209 }
 0x101   : > { %v201_v7 = vpop.permute.xlu0 %200 }
 0x102   : > { %v204_v9 = vsel %vm203_vm2, %v197_v5, %v201_v7 }
 0x103   : > { %389 = vmatpush3.msra.mxu0 %v204_v9 }
 0x104   : > { %391 = vmatmul.mubr.msk.f32.vlgmr.msra.gmra.mxu0 %vm212_vm3, %v205_v8 }
 0x1c4   : > { %v282_v11 = vpop.f32.mrf.mxu0 }
 0x1c5   : > { %v283_v12 = vadd.f32 %v282_v11, %v210_v10 }
 0x1c6   : > { %v392_v13 = vpop.f32.mrf.mxu0 }
 0x1c7   : > { %287 = vst.msk [vmem:[%s183_s19] sm:$0xff] %vm286_vm4, %v283_v12 }
 0x1c8   : > { %468 = shalt.err (!%p465_p5)
}
 0x1c9   : > { %s469_s5 = scalar_lea.hbm %s630_s27, 128  ;;  %s473_s8 = scalar_lea.hbm %s673_s3, 256 }
 0x1ca   : > { %p470_p6 = scmp.ne.s32.totalorder %s630_s27, %s469_s5  ;;  %p474_p10 = scmp.lt.s32.totalorder %s630_s27, %s673_s3 }
 0x1cb   : > { %p475_p11 = scmp.lt.s32.totalorder %s473_s8, %s469_s5 }
 0x1cc   : > { %p471_p7 = pnand %p470_p6, %p599_p4 }
 0x1cd   : > { %p476_p12 = por %p475_p11, %p474_p10 }
 0x1ce   : > { %p472_p9 = pneg %p471_p7 }
 0x1d0   : > { %p477_p13 = pnand %p476_p12, %p472_p9 }
 0x1d2   : > { %480 = shalt.err (!%p477_p13)
}
 0x1d3   : > { %393 = dma.vmem_to_hbm [thread:$0]  (%p599_p4), %s304_s21, 128, %s630_s27, %s289_s28  }
 0x1d4 PF: > { %p399_p0 = scmp.ge.s32.totalorder %s531_s17, 2  ;;  %s315_s11 = sand.u32 1, %s511_s12  }
 0x1d5   : > { %s316_s18 = scalar_lea.sflag [#allocation4], %s315_s11 }
 0x1d6   : > { %p396_p1 = pnand %p399_p0, %p606_p8 }
 0x1d8   : > { %p397_p2 = pneg %p396_p1 }
 0x1da   : > { %506 = dma.done.wait (%p397_p2), %s316_s18, 128  }
 0x1db   : > { %508 = vsyncadd (%p397_p2), %s316_s18, 4294967168  ;;  %s16_s17 = sadd.s32 1, %s531_s17   ;;  %s676_s12 = smov %s515_s13 }
 0x1dc   : > { %p13_p3 = scmp.ge.s32.totalorder %s16_s17, 4   ;;  %s677_s13 = smov %s519_s14 }
 0x1dd   : > { %s678_s14 = smov %s612_s25  ;;  %s679_s15 = smov %s527_s16 }
 0x1de   : > { %s680_s16 = smov %s682_s20  ;;  %15 = sbr.rel (!%p13_p3) target bundleno = 4 (0x4), region = 67 }
 0x1e3   :  { %321 = vsyncpa [#allocation4], 1 }
 0x1e4   :  { %323 = vsyncpa [#allocation4 + $0x1], 1 }

</bundles_post_ra>
